<compile_context>
chip_gen: v7x
topology: tpu7x:2x2x1
jax: 0.10.0
libtpu: 0.0.40
codegen_flags: <defaults>
</compile_context>

<pallas_src>
import functools

import jax
import jax.numpy as jnp
from jax import lax
from jax.experimental import pallas as pl
from jax.experimental.pallas import tpu as pltpu


def _resblock_kernel(x_ref, w1_ref, b1_ref, w2_ref, b2_ref, o_ref, *,
                     k_taps, pad, fuse_im2col, early_cast):
    # x_ref : (C, L)   one batch sample (batch dim squeezed by the BlockSpec)
    # w*_ref: (C, K*C) im2col weights   OR (K, C, C) per-tap weights
    # b*_ref: (C, 1)   f32 bias
    # o_ref : (C, L)
    c_out, l = o_ref.shape
    x = x_ref[...]                       # single HBM->VMEM read per sample
    cd = w1_ref.dtype                    # compute dtype (weights pre-cast)

    # Conv zero-padding edge masks: built once per tile, shared by both convs.
    # (1, L) iota broadcasts over channels -> no C*L int32 temporary.
    lane = lax.broadcasted_iota(jnp.int32, (1, l), 1)
    masks = {}
    for k in range(k_taps):
        s = pad - k
        if s > 0:
            masks[s] = lane < s
        elif s < 0:
            masks[s] = lane >= l + s

    def shift(v, s):
        # out[:, j] = v[:, j - s]; 0 where j - s falls outside [0, L).
        if s == 0:
            return v
        w = pltpu.roll(v, shift=s % l, axis=1)      # circular lane roll (XLU)
        return jnp.where(masks[s], jnp.zeros_like(w), w)

    def conv(w_ref, b_ref, v):
        if fuse_im2col:
            # Small C: one (C, K*C) @ (K*C, L) MXU matmul, f32 accumulation.
            rhs = jnp.concatenate([shift(v, pad - k) for k in range(k_taps)],
                                  axis=0).astype(cd)
            acc = jnp.dot(w_ref[...], rhs, preferred_element_type=jnp.float32)
        else:
            # Large C: K accumulated (C, C) @ (C, L) dots -- the contraction is
            # already MXU-deep per tap, and no (K*C, L) rhs is materialized.
            acc = jnp.dot(w_ref[0], shift(v, pad).astype(cd),
                          preferred_element_type=jnp.float32)
            for k in range(1, k_taps):
                acc += jnp.dot(w_ref[k], shift(v, pad - k).astype(cd),
                               preferred_element_type=jnp.float32)
        return acc + b_ref[...]

    xin = x.astype(cd) if early_cast else x
    h = jnp.maximum(conv(w1_ref, b1_ref, xin), 0.0)        # conv1 + ReLU (f32)
    hin = h.astype(cd) if early_cast else h
    y = conv(w2_ref, b2_ref, hin)                          # conv2        (f32)
    o_ref[...] = (y + x.astype(jnp.float32)).astype(o_ref.dtype)   # + skip(x)


def _vmem_limit_bytes(block_bytes):
    """Raise the scoped-VMEM limit above the per-generation defaults so
    double-buffered activation blocks compile; stay below physical capacity."""
    try:
        cap = pltpu.get_tpu_info().vmem_capacity_bytes
    except Exception:          # emulator / older jax: assume the v7x floor
        cap = 64 * 1024 * 1024
    want = max(32 * 1024 * 1024, 6 * int(block_bytes))   # x+out dbl-buf + slack
    return int(min(want, int(cap * 0.9)))


def residual_block(x, w1, b1, w2, b2, *, compute_dtype=None, early_cast=True,
                   im2col_threshold=256):
    """ResidualBlock forward: conv2(relu(conv1(x))) + x.

    x  : (N, C, L)          activations, PyTorch NCL layout (kept native)
    w* : (C_out, C_in, K)   Conv1d weights, PyTorch layout (K odd, pad=(K-1)//2)
    b* : (C_out,)           Conv1d biases
    compute_dtype : optional MXU operand dtype (e.g. jnp.bfloat16); weights are
                    pre-cast in the wrapper, accumulation is always f32.
    early_cast    : cast x/h to compute_dtype before building the K taps
                    (best on v6e/v7x). Set False on v5e (no native bf16 VPU):
                    taps stay f32 and only the dot operands are cast.
    im2col_threshold : fuse the K taps into one (C, K*C)@(K*C, L) dot when
                    K*C <= threshold; otherwise use K accumulated dots.
    """
    n, c, l = x.shape
    c_out, c_in, k_taps = w1.shape
    assert c_out == c and c_in == c and w2.shape == (c, c, k_taps)
    assert k_taps % 2 == 1 and k_taps <= l
    pad = (k_taps - 1) // 2

    wdt = compute_dtype if compute_dtype is not None else x.dtype
    fuse_im2col = (k_taps > 1) and (k_taps * c <= im2col_threshold)

    # Weight layout + cast done once in the wrapper (tiny arrays).
    if fuse_im2col:
        # Wm[o, k*C + i] = W[o, i, k]
        w1x = jnp.transpose(w1, (0, 2, 1)).reshape(c, k_taps * c).astype(wdt)
        w2x = jnp.transpose(w2, (0, 2, 1)).reshape(c, k_taps * c).astype(wdt)
        w_spec = pl.BlockSpec((c, k_taps * c), lambda nb: (0, 0))
    else:
        # Wt[k, o, i] = W[o, i, k]
        w1x = jnp.transpose(w1, (2, 0, 1)).astype(wdt)
        w2x = jnp.transpose(w2, (2, 0, 1)).astype(wdt)
        w_spec = pl.BlockSpec((k_taps, c, c), lambda nb: (0, 0, 0))
    b1c = b1.reshape(c, 1).astype(jnp.float32)
    b2c = b2.reshape(c, 1).astype(jnp.float32)
    b_spec = pl.BlockSpec((c, 1), lambda nb: (0, 0))

    # Native layout: one batch sample per grid step, batch dim squeezed.
    x_spec = pl.BlockSpec((None, c, l), lambda nb: (nb, 0, 0))

    kernel = functools.partial(_resblock_kernel, k_taps=k_taps, pad=pad,
                               fuse_im2col=fuse_im2col, early_cast=early_cast)

    block_bytes = c * l * x.dtype.itemsize
    vmem_limit = _vmem_limit_bytes(block_bytes)

    return pl.pallas_call(
        kernel,
        out_shape=jax.ShapeDtypeStruct((n, c, l), x.dtype),
        grid_spec=pltpu.PrefetchScalarGridSpec(
            num_scalar_prefetch=0,
            grid=(n,),
            in_specs=[
                x_spec,   # x  (N, C, L), blocked over batch
                w_spec,   # w1 (grid-invariant)
                b_spec,   # b1
                w_spec,   # w2
                b_spec,   # b2
            ],
            out_specs=x_spec,
        ),
        compiler_params=pltpu.CompilerParams(
            dimension_semantics=("parallel",),
            vmem_limit_bytes=vmem_limit),
    )(x, w1x, b1c, w2x, b2c)


def _reference(x, w1, b1, w2, b2):
    """Pure-JAX reference (matches torch Conv1d / ReLU / residual)."""
    dn = ("NCH", "OIH", "NCH")
    k = w1.shape[-1]
    p = (k - 1) // 2
    h = lax.conv_general_dilated(x, w1, (1,), [(p, p)],
                                 dimension_numbers=dn) + b1[None, :, None]
    h = jnp.maximum(h, 0.0)
    y = lax.conv_general_dilated(h, w2, (1,), [(p, p)],
                                 dimension_numbers=dn) + b2[None, :, None]
    return y + x


if __name__ == "__main__":
    N, C, L, K = 2, 8, 128, 3

    key = jax.random.PRNGKey(0)
    kx, kw1, kb1, kw2, kb2 = jax.random.split(key, 5)

    x = jax.random.normal(kx, (N, C, L), jnp.float32)
    # PyTorch Conv1d weight layout: (C_out, C_in, K); bias: (C_out,)
    w1 = jax.random.normal(kw1, (C, C, K), jnp.float32) * 0.1
    b1 = jax.random.normal(kb1, (C,), jnp.float32) * 0.1
    w2 = jax.random.normal(kw2, (C, C, K), jnp.float32) * 0.1
    b2 = jax.random.normal(kb2, (C,), jnp.float32) * 0.1

    ref = jax.block_until_ready(_reference(x, w1, b1, w2, b2))

    # f32, im2col path (K*C small)
    out = jax.block_until_ready(residual_block(x, w1, b1, w2, b2))
    assert out.shape == (N, C, L) and out.dtype == jnp.float32
    assert jnp.allclose(out, ref, atol=1e-5, rtol=1e-5), "f32 im2col mismatch"

    # f32, per-tap accumulated-dot path (large-C strategy, forced here)
    out_tap = jax.block_until_ready(
        residual_block(x, w1, b1, w2, b2, im2col_threshold=0))
    assert jnp.allclose(out_tap, ref, atol=1e-5, rtol=1e-5), "f32 per-tap mismatch"

    # bf16 MXU-operand path (early cast, v6e/v7x style), f32 accumulation
    out_bf16 = jax.block_until_ready(
        residual_block(x, w1, b1, w2, b2, compute_dtype=jnp.bfloat16))
    assert jnp.allclose(out_bf16, ref, atol=1e-1, rtol=1e-1), "bf16 mismatch"

    # bf16 with late cast (v5e style: f32 roll/mask chain, bf16 dot operands)
    out_bf16_late = jax.block_until_ready(
        residual_block(x, w1, b1, w2, b2, compute_dtype=jnp.bfloat16,
                       early_cast=False))
    assert jnp.allclose(out_bf16_late, ref, atol=1e-1, rtol=1e-1), "bf16-late mismatch"

    print("KERNEL_OK")
</pallas_src>

<mosaic_0001>
module attributes {stable_mosaic.version = 11 : i64} {
  func.func @_resblock_kernel(%arg0: i32, %arg1: memref<1x8x128xf32, #tpu.memory_space<vmem>>, %arg2: memref<8x24xf32, #tpu.memory_space<vmem>>, %arg3: memref<8x1xf32, #tpu.memory_space<vmem>>, %arg4: memref<8x24xf32, #tpu.memory_space<vmem>>, %arg5: memref<8x1xf32, #tpu.memory_space<vmem>>, %arg6: memref<1x8x128xf32, #tpu.memory_space<vmem>>) attributes {dimension_semantics = [#tpu.dimension_semantics<parallel>], iteration_bounds = array<i64: 2>, scalar_prefetch = 0 : i64, scratch_operands = 0 : i64, tpu.core_type = #tpu.core_type<tc>, window_params = [{transform_indices = @transform_0, window_bounds = array<i64: 1, 8, 128>}, {pipeline_mode = #tpu.pipeline_mode<synchronous>, transform_indices = @transform_1, window_bounds = array<i64: 8, 24>}, {pipeline_mode = #tpu.pipeline_mode<synchronous>, transform_indices = @transform_2, window_bounds = array<i64: 8, 1>}, {pipeline_mode = #tpu.pipeline_mode<synchronous>, transform_indices = @transform_3, window_bounds = array<i64: 8, 24>}, {pipeline_mode = #tpu.pipeline_mode<synchronous>, transform_indices = @transform_4, window_bounds = array<i64: 8, 1>}, {transform_indices = @transform_5, window_bounds = array<i64: 1, 8, 128>}]} {
    %c0 = arith.constant 0 : index
    %c0_0 = arith.constant 0 : index
    %c0_1 = arith.constant 0 : index
    %0 = vector.load %arg1[%c0, %c0_0, %c0_1] : memref<1x8x128xf32, #tpu.memory_space<vmem>>, vector<1x8x128xf32>
    %1 = vector.shape_cast %0 : vector<1x8x128xf32> to vector<8x128xf32>
    %2 = tpu.iota {dimensions = array<i32: 1>} : vector<1x128xi32>
    %c1_i32 = arith.constant 1 : i32
    %3 = vector.broadcast %c1_i32 : i32 to vector<1x128xi32>
    %4 = arith.cmpi slt, %2, %3 : vector<1x128xi32>
    %c127_i32 = arith.constant 127 : i32
    %5 = vector.broadcast %c127_i32 : i32 to vector<1x128xi32>
    %6 = arith.cmpi sge, %2, %5 : vector<1x128xi32>
    %c1_i32_2 = arith.constant 1 : i32
    %7 = tpu.dynamic_rotate %1 by %c1_i32_2 dim 1 : vector<8x128xf32>, i32 -> vector<8x128xf32>
    %cst = arith.constant 0.000000e+00 : f32
    %8 = vector.broadcast %cst : f32 to vector<8x128xf32>
    %9 = vector.shape_cast %4 : vector<1x128xi1> to vector<1x128xi1>
    %10 = vector.broadcast %9 : vector<1x128xi1> to vector<8x128xi1>
    %11 = arith.select %10, %8, %7 : vector<8x128xi1>, vector<8x128xf32>
    %c127_i32_3 = arith.constant 127 : i32
    %12 = tpu.dynamic_rotate %1 by %c127_i32_3 dim 1 : vector<8x128xf32>, i32 -> vector<8x128xf32>
    %cst_4 = arith.constant 0.000000e+00 : f32
    %13 = vector.broadcast %cst_4 : f32 to vector<8x128xf32>
    %14 = vector.shape_cast %6 : vector<1x128xi1> to vector<1x128xi1>
    %15 = vector.broadcast %14 : vector<1x128xi1> to vector<8x128xi1>
    %16 = arith.select %15, %13, %12 : vector<8x128xi1>, vector<8x128xf32>
    %17 = tpu.concatenate %11, %1, %16 in 0 : vector<8x128xf32>, vector<8x128xf32>, vector<8x128xf32> -> vector<24x128xf32>
    %c0_5 = arith.constant 0 : index
    %c0_6 = arith.constant 0 : index
    %18 = vector.load %arg2[%c0_5, %c0_6] : memref<8x24xf32, #tpu.memory_space<vmem>>, vector<8x24xf32>
    %cst_7 = arith.constant dense<0.000000e+00> : vector<8x128xf32>
    %19 = tpu.matmul %18, %17, %cst_7 {dimension_numbers = #tpu.dot_dimension_numbers<[1], [0], [0], [1], [0, 0, 1, 1], [], []>} : vector<8x24xf32>, vector<24x128xf32>, vector<8x128xf32> -> vector<8x128xf32>
    %c0_8 = arith.constant 0 : index
    %c0_9 = arith.constant 0 : index
    %20 = vector.load %arg3[%c0_8, %c0_9] : memref<8x1xf32, #tpu.memory_space<vmem>>, vector<8x1xf32>
    %21 = vector.broadcast %20 : vector<8x1xf32> to vector<8x128xf32>
    %22 = arith.addf %19, %21 : vector<8x128xf32>
    %cst_10 = arith.constant 0.000000e+00 : f32
    %23 = vector.broadcast %cst_10 : f32 to vector<8x128xf32>
    %24 = arith.maximumf %22, %23 : vector<8x128xf32>
    %c1_i32_11 = arith.constant 1 : i32
    %25 = tpu.dynamic_rotate %24 by %c1_i32_11 dim 1 : vector<8x128xf32>, i32 -> vector<8x128xf32>
    %cst_12 = arith.constant 0.000000e+00 : f32
    %26 = vector.broadcast %cst_12 : f32 to vector<8x128xf32>
    %27 = vector.shape_cast %4 : vector<1x128xi1> to vector<1x128xi1>
    %28 = vector.broadcast %27 : vector<1x128xi1> to vector<8x128xi1>
    %29 = arith.select %28, %26, %25 : vector<8x128xi1>, vector<8x128xf32>
    %c127_i32_13 = arith.constant 127 : i32
    %30 = tpu.dynamic_rotate %24 by %c127_i32_13 dim 1 : vector<8x128xf32>, i32 -> vector<8x128xf32>
    %cst_14 = arith.constant 0.000000e+00 : f32
    %31 = vector.broadcast %cst_14 : f32 to vector<8x128xf32>
    %32 = vector.shape_cast %6 : vector<1x128xi1> to vector<1x128xi1>
    %33 = vector.broadcast %32 : vector<1x128xi1> to vector<8x128xi1>
    %34 = arith.select %33, %31, %30 : vector<8x128xi1>, vector<8x128xf32>
    %35 = tpu.concatenate %29, %24, %34 in 0 : vector<8x128xf32>, vector<8x128xf32>, vector<8x128xf32> -> vector<24x128xf32>
    %c0_15 = arith.constant 0 : index
    %c0_16 = arith.constant 0 : index
    %36 = vector.load %arg4[%c0_15, %c0_16] : memref<8x24xf32, #tpu.memory_space<vmem>>, vector<8x24xf32>
    %cst_17 = arith.constant dense<0.000000e+00> : vector<8x128xf32>
    %37 = tpu.matmul %36, %35, %cst_17 {dimension_numbers = #tpu.dot_dimension_numbers<[1], [0], [0], [1], [0, 0, 1, 1], [], []>} : vector<8x24xf32>, vector<24x128xf32>, vector<8x128xf32> -> vector<8x128xf32>
    %c0_18 = arith.constant 0 : index
    %c0_19 = arith.constant 0 : index
    %38 = vector.load %arg5[%c0_18, %c0_19] : memref<8x1xf32, #tpu.memory_space<vmem>>, vector<8x1xf32>
    %39 = vector.broadcast %38 : vector<8x1xf32> to vector<8x128xf32>
    %40 = arith.addf %37, %39 : vector<8x128xf32>
    %41 = arith.addf %40, %1 : vector<8x128xf32>
    %c0_20 = arith.constant 0 : index
    %c0_21 = arith.constant 0 : index
    %c0_22 = arith.constant 0 : index
    %42 = vector.load %arg6[%c0_20, %c0_21, %c0_22] : memref<1x8x128xf32, #tpu.memory_space<vmem>>, vector<1x8x128xf32>
    %43 = vector.shape_cast %42 : vector<1x8x128xf32> to vector<8x128xf32>
    %44 = vector.shape_cast %41 : vector<8x128xf32> to vector<1x8x128xf32>
    tpu.vector_store %arg6[%c0_20, %c0_21, %c0_22], %44 {strides = array<i32>} : memref<1x8x128xf32, #tpu.memory_space<vmem>>, vector<1x8x128xf32>,
    return
  }
  func.func @transform_0(%arg0: i32) -> (i32, i32, i32) {
    %c0_i32 = arith.constant 0 : i32
    %c0_i32_0 = arith.constant 0 : i32
    %c0_i32_1 = arith.constant 0 : i32
    return %arg0, %c0_i32, %c0_i32_0 : i32, i32, i32
  }
  func.func @transform_1(%arg0: i32) -> (i32, i32) {
    %c0_i32 = arith.constant 0 : i32
    %c0_i32_0 = arith.constant 0 : i32
    %c0_i32_1 = arith.constant 0 : i32
    return %c0_i32, %c0_i32_0 : i32, i32
  }
  func.func @transform_2(%arg0: i32) -> (i32, i32) {
    %c0_i32 = arith.constant 0 : i32
    %c0_i32_0 = arith.constant 0 : i32
    %c0_i32_1 = arith.constant 0 : i32
    return %c0_i32, %c0_i32_0 : i32, i32
  }
  func.func @transform_3(%arg0: i32) -> (i32, i32) {
    %c0_i32 = arith.constant 0 : i32
    %c0_i32_0 = arith.constant 0 : i32
    %c0_i32_1 = arith.constant 0 : i32
    return %c0_i32, %c0_i32_0 : i32, i32
  }
  func.func @transform_4(%arg0: i32) -> (i32, i32) {
    %c0_i32 = arith.constant 0 : i32
    %c0_i32_0 = arith.constant 0 : i32
    %c0_i32_1 = arith.constant 0 : i32
    return %c0_i32, %c0_i32_0 : i32, i32
  }
  func.func @transform_5(%arg0: i32) -> (i32, i32, i32) {
    %c0_i32 = arith.constant 0 : i32
    %c0_i32_0 = arith.constant 0 : i32
    %c0_i32_1 = arith.constant 0 : i32
    return %arg0, %c0_i32, %c0_i32_0 : i32, i32, i32
  }
}

</mosaic_0001>

<bundles_post_ra>
// kernel: tpu_custom_call.1
= control target key start
LH: loop header
LB: loop body
LE: loop exit
PB: predicated region body
PF: predicated region fallthrough
CT: control target
= control target key end

     0   :  { %10 = vsyncpa [#allocation3], 0  ;;  %s911_s0 = inlined_call_operand.vmem [shape: f32[2,8,128], index: 0, kind: input, shape index: {}]   ;;  %s912_s1 = inlined_call_operand.hbm [shape: f32[8,24], index: 1, kind: input, shape index: {}]   ;;  %s913_s2 = inlined_call_operand.vmem [shape: f32[8,1], index: 2, kind: input, shape index: {}]   ;;  %s914_s3 = inlined_call_operand.vmem [shape: f32[8,24], index: 3, kind: input, shape index: {}]   ;;  %s915_s4 = inlined_call_operand.vmem [shape: f32[8,1], index: 4, kind: input, shape index: {}]   ;;  %s916_s5 = inlined_call_operand.hbm [shape: f32[2,8,128], index: 5, kind: output, shape index: {}]  }
   0x1   :  { %11 = vsyncpa [#allocation4], 0 }
   0x2   :  { %13 = vsyncpa [#allocation4 + $0x1], 0  ;;  %s755_s18 = smov 0   ;;  %s757_s19 = smov 0  }
   0x3   :  { %s759_s20 = smov 0   ;;  %s761_s21 = smov 0  }
   0x4 LB: > { %s776_s22 = sadd.s32 4294967295, %s714_s21   ;;  %s503_s23 = sadd.s32 4294967294, %s714_s21   ;;  %s714_s21 = sphi %s761_s21, %s934_s21   ;;  %s710_s20 = sphi %s759_s20, %s933_s20   ;;  %s706_s19 = sphi %s757_s19, %s932_s19   ;;  %s702_s18 = sphi %s755_s18, %s931_s18  }
   0x5   : > { %s780_s24 = sadd.s32 1, %s714_s21   ;;  %s136_s25 = sadd.s32 1, %s710_s20 }
   0x6   : > { %s133_s26 = ssub.s32 %s714_s21, %s780_s24  ;;  %p146_p0 = scmp.ne.s32.totalorder %s710_s20, %s706_s19 }
   0x7   : > { %p134_p1 = scmp.eq.s32.totalorder %s133_s26, 0  ;;  %p147_p2 = scmp.eq.s32.totalorder %s776_s22, 1 }
   0x8   : > { %p152_p3 = scmp.ne.s32.totalorder %s706_s19, %s702_s18  ;;  %p153_p4 = scmp.eq.s32.totalorder %s503_s23, 1 }
   0x9   : > { %s791_s27 = scalar_select %p134_p1, %s710_s20, %s136_s25  }
   0xa   : > { %p793_p5 = por %p147_p2, %p146_p0  ;;  %p797_p6 = por %p153_p4, %p152_p3 }
   0xb   : > { %p504_p7 = scmp.ge.s32.totalorder %s714_s21, 1  ;;  %p160_p8 = scmp.lt.s32.totalorder %s714_s21, 3 }
   0xc   : > { %s920_s28 = scalar_select %p793_p5, 1, 0 }
   0xd   : > { %s921_s29 = scalar_select %p797_p6, 1, 0 }
   0xe   : > { %p917_p9 = scmp.eq.s32.totalorder %s776_s22, 0  ;;  %p804_p10 = pnand %p504_p7, %p160_p8 }
   0xf   : > { %s716_s6 = smov [#allocation2]   ;;  %s620_s11 = scalar_lea.hbm %s912_s1, 128 }
  0x10   : > { %s922_s30 = scalar_select %p804_p10, 1, 0 }
  0x11   : > { %s173_s7 = sshll.u32 %s716_s6, 4  ;;  %p567_p11 = pneg %p804_p10  ;;  %s174_s7 = int_to_ptr.vmem [resolvable:$true] %s173_s7 }
  0x12   : > { %p621_p13 = scmp.ne.s32.totalorder %s912_s1, %s620_s11  ;;  %p627_p3 = scmp.lt.u32.totalorder %s620_s11, %s912_s1 }
  0x13   : > { %p812_p12 = pnand %p917_p9, %p567_p11 }
  0x15   : > { %p622_p0 = pneg %p812_p12 }
  0x17   : > { %p623_p1 = pnand %p622_p0, %p621_p13 }
  0x19   : > { %p624_p2 = pneg %p623_p1 }
  0x1b   : > { %p629_p4 = pnand %p627_p3, %p624_p2 }
  0x1d   : > { %632 = shalt.err (!%p629_p4)
}
  0x1e   : > { %s633_s16 = scalar_lea.vmem %s174_s7, 128  ;;  %p641_p9 = scmp.lt.s32.totalorder %s174_s7, %s174_s7 }
  0x1f   : > { %p634_p7 = scmp.ne.s32.totalorder %s174_s7, %s633_s16  ;;  %p642_p6 = scmp.lt.s32.totalorder %s633_s16, %s633_s16 }
  0x21   : > { %p636_p8 = pnand %p634_p7, %p622_p0  ;;  %p643_p5 = por %p642_p6, %p641_p9 }
  0x23   : > { %p637_p11 = pneg %p636_p8 }
  0x25   : > { %p644_p10 = pnand %p643_p5, %p637_p11 }
  0x27   : > { %647 = shalt.err (!%p644_p10)
}
  0x28   : > { %570 = dma.hbm_to_vmem [thread:$0]  (!%p812_p12), %s912_s1, 128, %s174_s7, [#allocation3]  }
  0x29   : > { %p924_p13 = scmp.ne.s32.totalorder %s922_s30, 0 }
  0x2a   : > { %p925_p1 = scmp.eq.s32.totalorder (!%p924_p13), %s776_s22, 0 }
  0x2b   : > { %202 = sbr.rel (%p924_p13) target bundleno = 748 (0x2ec), region = 40 }
  0x32   : > { %693 = dma.done.wait (%p925_p1), [#allocation3], 128   ;;  %p926_p0 = pmov %p925_p1 }
  0x33   : > { %p229_p6 = scmp.lt.s32.totalorder %s776_s22, 1  ;;  %v717_v0 = vmov 0.0|0.0   ;;  %vm718_vm0 = vmmov 0   ;;  %v719_v1 = vmov 0.0   ;;  %v720_v2 = vmov 0   ;;  %v249_v4 = vld [vmem:[%s913_s2] sm:$0xff] }
  0x34   : > { %695 = vsyncadd (%p926_p0), [#allocation3], 4294967168  ;;  %553 = vmatprep.subr.bf16.mxu0 %v717_v0  ;;  %557 = vmatprep.subr.bf16.mxu1 %v717_v0  ;;  %s721_s10 = smov 1   ;;  %s722_s11 = smov 127   ;;  %v234_v5 = vlaneseq  ;;  %vm723_vm2 = vmmov 1   ;;  %v248_v11 = vld [vmem:[#allocation2] sm:$0xff] }
  0x35   : > { %s230_s25 = scalar_select %p229_p6, %s776_s22, 1  ;;  %541 = vmatprep.mubr.msk.f32.mxu0 %vm718_vm0, %v719_v1  ;;  %550 = vmatprep.mubr.msk.f32.mxu1 %vm718_vm0, %v719_v1  ;;  %vm255_vm5 = vcmask 195584   ;;  %v337_v17 = vld [vmem:[%s915_s4] sm:$0xff] }
  0x36   : > { %618 = vset.pattern.permute.xlu1 %v720_v2  ;;  %619 = vset.pattern.permute.xlu0 %v720_v2  ;;  %v235_v6 = vand.u32 127, %v234_v5  ;;  %v336_v20 = vld [vmem:[%s914_s3] sm:$0xff]  ;;  %s226_s16 = sand.u32 1, %s706_s19   ;;  %s522_s23 = sshll.u32 %s776_s22, 7 }
  0x37   : > { %s510_s26 = sshll.u32 %s230_s25, 3  ;;  %252 = vperm.xlu1 %618, %v249_v4   ;;  %s509_s17 = sshll.u32 %s226_s16, 3 }
  0x38   : > { %s232_s7 = scalar_lea.vmem %s911_s0, %s510_s26  ;;  %vm525_vm1 = vcmp.ge.s32.totalorder %v235_v6, 1  ;;  %vm526_vm4 = vcmp.lt.s32.totalorder %v235_v6, 127  ;;  %s228_s25 = scalar_lea.vmem [#allocation5], %s509_s17 }
  0x39   : > { %v233_v3 = vld [vmem:[%s232_s7] sm:$0xff]  ;;  %vm846_vm3 = vmpackc.low %vm723_vm2, %vm525_vm1  ;;  %s432_s26 = sshll.u32 %s228_s25, 4  ;;  %s869_s7 = scalar_lea.hbm %s916_s5, %s522_s23  ;;  %s871_s26 = int_to_ptr.vmem [resolvable:$true] %s432_s26 }
  0x3a   : > { %238 = vrot.lane.b32.xlu0 %v233_v3, %s721_s10  ;;  %s419_s8 = scalar_lea.sflag [#allocation4], %s226_s16  ;;  %s648_s9 = scalar_lea.vmem %s871_s26, 128 }
  0x3b   : > { %p649_p5 = scmp.ne.s32.totalorder %s871_s26, %s648_s9  ;;  %p929_p9 = scmp.ne.s32.totalorder %s920_s28, 0 }
  0x3c   : > { %s724_s22 = smov [#allocation5]  }
  0x3d   : > { %p650_p10 = pnand %p649_p5, %p929_p9 }
  0x3e   : > { %243 = vrot.lane.b32.xlu0 %v233_v3, %s722_s11 }
  0x3f   : > { %p651_p12 = pneg %p650_p10 }
  0xac   : > { %v239_v7 = vpop.permute.xlu0 %238 }
  0xad   : > { %v554_v9 = vpack.c.bf16 %v233_v3, %v239_v7 }
  0xaf   : > { %556 = vmatpush3.bf16.msk.msra.mxu0 %vm846_vm3, %v554_v9 }
  0xb0   : > { %539 = vmatprep.subr.mxu0 %v719_v1  ;;  %v244_v10 = vpop.permute.xlu0 %243 }
  0xb3   : > { %540 = vmatpush3.msk.msra.mxu0 %vm526_vm4, %v244_v10 }
  0xb4   : > { %542 = vmatmul.mubr.msk.f32.vlgmr.msra.gmra.mrb[0].mxu0 %vm255_vm5, %v248_v11 }
  0xb6   : > { %v253_v12 = vpop.permute.xlu1 %252 }
 0x187   : > { %v325_v13 = vpop.f32.mrb[0].mxu0 }
 0x188   : > { %v326_v14 = vadd.f32 %v325_v13, %v253_v12  ;;  %v543_v15 = vpop.f32.mrb[1].mxu0 }
 0x18a   : > { %v329_v16 = vmax.f32 %v326_v14, 0.0 }
 0x18c   : > { %333 = vrot.lane.b32.xlu0 %v329_v16, %s722_s11  ;;  %330 = vrot.lane.b32.xlu1 %v329_v16, %s721_s10  ;;  %s652_s10 = sshll.u32 %s724_s22, 4  ;;  %s653_s10 = int_to_ptr.vmem [resolvable:$false] %s652_s10 }
 0x18d   : > { %s654_s11 = scalar_lea.vmem %s653_s10, 256  ;;  %p655_p2 = scmp.lt.s32.totalorder %s871_s26, %s653_s10 }
 0x18e   : > { %p656_p3 = scmp.lt.s32.totalorder %s654_s11, %s648_s9 }
 0x190   : > { %340 = vperm.xlu1 %618, %v337_v17   ;;  %p657_p4 = por %p656_p3, %p655_p2 }
 0x192   : > { %p658_p7 = pnand %p657_p4, %p651_p12 }
 0x1fe   : > { %v331_v18 = vpop.permute.xlu1 %330  ;;  %v334_v21 = vpop.permute.xlu0 %333 }
 0x1ff   : > { %v558_v19 = vpack.c.bf16 %v329_v16, %v331_v18 }
 0x201   : > { %560 = vmatpush3.bf16.msk.msra.mxu1 %vm846_vm3, %v558_v19 }
 0x202   : > { %548 = vmatprep.subr.mxu1 %v719_v1 }
 0x205   : > { %549 = vmatpush3.msk.msra.mxu1 %vm526_vm4, %v334_v21 }
 0x206   : > { %551 = vmatmul.mubr.msk.f32.vlgmr.msra.gmra.mrb[0].mxu1 %vm255_vm5, %v336_v20 }
 0x20f   : > { %v341_v22 = vpop.permute.xlu1 %340 }
 0x2d9   : > { %v412_v23 = vpop.f32.mrb[0].mxu1 }
 0x2da   : > { %v413_v24 = vadd.f32 %v412_v23, %v341_v22  ;;  %v552_v25 = vpop.f32.mrb[1].mxu1 }
 0x2dc   : > { %v416_v26 = vadd.f32 %v413_v24, %v233_v3 }
 0x2de   : > { %417 = vst [vmem:[%s228_s25] sm:$0xff] %v416_v26 }
 0x2df   : > { %661 = shalt.err (!%p658_p7)
}
 0x2e0   : > { %s662_s12 = scalar_lea.hbm %s869_s7, 128  ;;  %s666_s15 = scalar_lea.hbm %s916_s5, 256 }
 0x2e1   : > { %p663_p8 = scmp.ne.s32.totalorder %s869_s7, %s662_s12  ;;  %p667_p1 = scmp.lt.u32.totalorder %s869_s7, %s916_s5 }
 0x2e2   : > { %p668_p0 = scmp.lt.u32.totalorder %s666_s15, %s662_s12  ;;  %p670_p5 = scmp.lt.u32.totalorder %s662_s12, %s869_s7 }
 0x2e3   : > { %p664_p11 = pnand %p663_p8, %p929_p9 }
 0x2e4   : > { %p669_p6 = por %p668_p0, %p667_p1 }
 0x2e5   : > { %p665_p13 = pneg %p664_p11 }
 0x2e6   : > { %p671_p10 = por %p670_p5, %p669_p6 }
 0x2e8   : > { %p672_p12 = pnand %p671_p10, %p665_p13 }
 0x2ea   : > { %675 = shalt.err (!%p672_p12)
}
 0x2eb   : > { %565 = dma.vmem_to_hbm [thread:$0]  (%p929_p9), %s871_s26, 128, %s869_s7, %s419_s8  }
 0x2ec PF: > { %p577_p2 = scmp.ge.s32.totalorder %s714_s21, 2  ;;  %s444_s23 = sand.u32 1, %s702_s18  }
 0x2ed   : > { %p930_p3 = scmp.ne.s32.totalorder %s921_s29, 0  ;;  %s445_s25 = scalar_lea.sflag [#allocation4], %s444_s23 }
 0x2ef   : > { %p572_p4 = pnand %p577_p2, %p930_p3 }
 0x2f1   : > { %697 = dma.done.wait (!%p572_p4), %s445_s25, 128  }
 0x2f2   : > { %699 = vsyncadd (!%p572_p4), %s445_s25, 4294967168  ;;  %p16_p7 = scmp.ge.s32.totalorder %s780_s24, 4   ;;  %s931_s18 = smov %s706_s19 }
 0x2f3   : > { %s932_s19 = smov %s710_s20  ;;  %s933_s20 = smov %s791_s27 }
 0x2f4   : > { %s934_s21 = smov %s780_s24  ;;  %18 = sbr.rel (!%p16_p7) target bundleno = 4 (0x4), region = 80 }
 0x2fb   :  { %450 = vsyncpa [#allocation3], 1 }
 0x2fc   :  { %452 = vsyncpa [#allocation3 + $0x1], 1 }
 0x2fd   :  { %453 = vsyncpa [#allocation4], 1 }
 0x2fe   :  { %455 = vsyncpa [#allocation4 + $0x1], 1 }

</bundles_post_ra>
